<compile_context>
chip_gen: v7x
topology: tpu7x:2x2x1
jax: 0.10.0
libtpu: 0.0.40
codegen_flags: <defaults>
</compile_context>

<pallas_src>
import functools

import jax
import jax.numpy as jnp
from jax.experimental import pallas as pl
from jax.experimental.pallas import tpu as pltpu


def _round_up(x, m):
    return ((x + m - 1) // m) * m


def _force_block_kernel(x_ref, w12_ref, consts_ref, sp_ref, o_ref, *, act_dtype):
    # x_ref:      (A_blk, S, C)   compute dtype (f32 or bf16)
    # w12_ref:    (2C, C)         compute dtype (fc1.weight^T ; fc2.weight^T stacked)
    # consts_ref: (8, C)  f32     row0 = b1, row1 = b2, row2 = fc3.weight
    # sp_ref:     (S, 128) f32    sphere_points / S, zero-padded to 128 lanes
    # o_ref:      (A_blk, 128) f32 lane-dense output slab (forces in lanes 0..2)
    A, S, C = x_ref.shape
    cdt = w12_ref.dtype

    # TODO(synk): with C < 128 every vreg is only C/128 lane-occupied; a channel-first
    # layout (h^T = w^T @ x^T with the merged A*S axis on lanes) would fix this, but
    # the kernel is HBM-bound on the x stream at eSCN sizes so it is left as-is.
    x = x_ref[...].reshape(A * S, C)            # leading-dim merge -> no relayout

    w12 = w12_ref[...]
    w1 = w12[:C, :]
    w2 = w12[C:, :]
    consts = consts_ref[...]
    b1 = consts[0:1, :].astype(act_dtype)
    b2 = consts[1:2, :].astype(act_dtype)
    w3 = consts[2:3, :]                          # f32 for the channel reduction

    # fc1 (+bias) + SiLU.  MXU matmul accumulates in f32; bias-add + activation run in
    # act_dtype (bf16 on v6e/v7x bf16 path, f32 otherwise).
    h = jnp.dot(x, w1, preferred_element_type=jnp.float32)
    h = jax.nn.silu(h.astype(act_dtype) + b1)
    # fc2 (+bias) + SiLU (h is already in cdt when act_dtype == cdt -> no extra cast).
    h = jnp.dot(h.astype(cdt), w2, preferred_element_type=jnp.float32)
    h = jax.nn.silu(h.astype(act_dtype) + b2)

    # fc3 (no bias): per-(atom, sample) scalar = <h, w3>, reduced in f32 on the XLU.
    s_val = jnp.sum((h.astype(jnp.float32) * w3).reshape(A, S, C), axis=-1)   # (A, S)

    # forces = s_val @ (sphere_points / S); sp is zero-padded to 128 lanes so the
    # output store is a full-width, unmasked vst.
    o_ref[...] = jnp.dot(s_val, sp_ref[...],
                         preferred_element_type=jnp.float32).astype(o_ref.dtype)


def _hw_config():
    """Generation-aware VMEM limit, per-step x-DMA budget, minimum grid steps."""
    kind = ""
    try:
        kind = jax.devices()[0].device_kind.lower()
    except Exception:
        pass
    vmem_cap = None
    try:
        vmem_cap = int(pltpu.get_tpu_info().vmem_capacity_bytes)
    except Exception:
        pass
    is_v7 = "v7" in kind
    is_v5 = ("v5" in kind) and not is_v7
    if vmem_cap is None or vmem_cap <= 0:
        vmem_cap = (64 if is_v7 else 128) * 1024 * 1024
    if is_v7:
        # 64 MiB VMEM per TC, 2 TCs: >= 4 steps per core, ~8 MiB of x per step.
        cfg = dict(vmem_limit=48 * 1024 * 1024, x_budget=8 * 1024 * 1024,
                   min_steps=8, bf16_act_ok=True)
    elif is_v5:
        # 128 MiB VMEM, ~820 GB/s HBM; no bf16 VPU/EUP -> keep activations in f32.
        cfg = dict(vmem_limit=96 * 1024 * 1024, x_budget=12 * 1024 * 1024,
                   min_steps=4, bf16_act_ok=False)
    else:
        # v6e (default): 128 MiB VMEM, single TC.
        cfg = dict(vmem_limit=96 * 1024 * 1024, x_budget=12 * 1024 * 1024,
                   min_steps=4, bf16_act_ok=True)
    cfg["vmem_limit"] = min(cfg["vmem_limit"], (vmem_cap * 3) // 4)
    return cfg


def _default_act_dtype(compute_dtype, cfg):
    if compute_dtype == jnp.dtype(jnp.bfloat16) and cfg["bf16_act_ok"]:
        return jnp.dtype(jnp.bfloat16)
    return jnp.dtype(jnp.float32)


def _pick_atoms_per_block(num_atoms, S, C, compute_itemsize, act_itemsize, cfg):
    """Size blocks from the per-step DMA budget, min grid steps and VMEM footprint."""
    x_atom = S * C * compute_itemsize                    # x block bytes / atom
    inter_atom = S * C * (4 + act_itemsize + 4)          # f32 acc + act h + f32 product
    out_atom = 2 * 128 * 4                               # double-buffered out slab row
    weights_bytes = 2 * C * C * compute_itemsize + 8 * C * 4 + S * 128 * 4

    apb = max(1, cfg["x_budget"] // max(1, x_atom))      # per-step x-DMA target
    apb = min(apb, max(1, -(-num_atoms // cfg["min_steps"])))   # keep >= min_steps
    apb = min(apb, num_atoms)
    apb = max(8, (apb // 8) * 8)                          # sublane-aligned out block

    budget = int(cfg["vmem_limit"] * 0.7) - weights_bytes
    footprint = lambda a: a * (2 * x_atom + inter_atom + out_atom)
    while apb > 8 and footprint(apb) > budget:
        apb -= 8
    # TODO(synk): if footprint(8) still exceeds the budget (huge S*C), the block would
    # also need to tile the sphere-sample axis; not needed at eSCN sizes.
    return apb


def force_block_forward(x_pt, sphere_points, params, *,
                        atoms_per_block=None, compute_dtype=jnp.float32,
                        act_dtype=None, return_slab=False):
    """x_pt: (num_atoms, S, C), sphere_points: (S, 3) -> forces (num_atoms, 3) f32."""
    num_atoms, S, C = x_pt.shape
    w1, b1, w2, b2, w3 = params      # (C,C) (1,C) (C,C) (1,C) (1,C)
    compute_dtype = jnp.dtype(compute_dtype)
    cfg = _hw_config()
    if act_dtype is None:
        act_dtype = _default_act_dtype(compute_dtype, cfg)
    act_dtype = jnp.dtype(act_dtype)

    # Prefer producing x already in compute_dtype upstream; this cast is a full HBM
    # read+write pass over x when the dtypes differ.
    x = x_pt if x_pt.dtype == compute_dtype else x_pt.astype(compute_dtype)

    if atoms_per_block is None:
        atoms_per_block = _pick_atoms_per_block(
            num_atoms, S, C, compute_dtype.itemsize, act_dtype.itemsize, cfg)
    apb = atoms_per_block
    assert apb % 8 == 0, "atoms_per_block must be a multiple of 8"

    # Pack parameters once in the wrapper (single DMA each, 1/S folded into sp).
    w12 = jnp.concatenate([w1, w2], axis=0).astype(compute_dtype)        # (2C, C)
    consts = jnp.zeros((8, C), jnp.float32)
    consts = consts.at[0].set(b1.reshape(C).astype(jnp.float32))
    consts = consts.at[1].set(b2.reshape(C).astype(jnp.float32))
    consts = consts.at[2].set(w3.reshape(C).astype(jnp.float32))
    sp_pad = jnp.zeros((S, 128), jnp.float32).at[:, :3].set(
        sphere_points.astype(jnp.float32) / float(S))

    # No jnp.pad: the partial tail block reads garbage rows (row-independent) and its
    # out-of-bounds rows are masked on writeback.
    grid = (pl.cdiv(num_atoms, apb),)
    full = lambda i: (0, 0)

    out_slab = pl.pallas_call(
        functools.partial(_force_block_kernel, act_dtype=act_dtype),
        out_shape=jax.ShapeDtypeStruct((num_atoms, 128), jnp.float32),
        grid_spec=pltpu.PrefetchScalarGridSpec(
            num_scalar_prefetch=0,
            grid=grid,
            in_specs=[
                pl.BlockSpec((apb, S, C), lambda i: (i, 0, 0)),   # x (only real traffic)
                pl.BlockSpec((2 * C, C), full),                   # w1 ; w2
                pl.BlockSpec((8, C), full),                       # b1, b2, fc3.weight
                pl.BlockSpec((S, 128), full),                     # sphere_points / S
            ],
            out_specs=pl.BlockSpec((apb, 128), lambda i: (i, 0)),  # lane-dense slab
        ),
        compiler_params=pltpu.CompilerParams(
            dimension_semantics=("parallel",),
            vmem_limit_bytes=cfg["vmem_limit"],
        ),
    )(x, w12, consts, sp_pad)

    if return_slab:
        return out_slab            # (num_atoms, 128); forces live in lanes 0..2
    return out_slab[:, :3]


def _reference_f32(x_pt, sphere_points, params):
    """Pure-JAX reference mirroring the PyTorch forward exactly (f32)."""
    w1, b1, w2, b2, w3 = params
    num_atoms, S, C = x_pt.shape
    x = x_pt.reshape(-1, C)
    x = jax.nn.silu(x @ w1 + b1)
    x = jax.nn.silu(x @ w2 + b2)
    x = x @ w3.T                                  # (N*S, 1) — fc3, no bias
    x = x.reshape(-1, S, 1)
    forces = x * sphere_points.reshape(1, S, 3)
    return jnp.sum(forces, axis=1) / S


def _reference_matched(x_pt, sphere_points, params, compute_dtype, act_dtype):
    """Reference mirroring the kernel's mixed-precision math (bf16 operands and/or
    bf16 activations, f32 accumulation) for validating the perf path."""
    w1, b1, w2, b2, w3 = params
    num_atoms, S, C = x_pt.shape
    x = x_pt.reshape(-1, C).astype(compute_dtype)
    h = jnp.dot(x, w1.astype(compute_dtype), preferred_element_type=jnp.float32)
    h = jax.nn.silu(h.astype(act_dtype) + b1.astype(act_dtype))
    h = jnp.dot(h.astype(compute_dtype), w2.astype(compute_dtype),
                preferred_element_type=jnp.float32)
    h = jax.nn.silu(h.astype(act_dtype) + b2.astype(act_dtype))
    s = jnp.sum(h.astype(jnp.float32) * w3, axis=-1).reshape(num_atoms, S)
    return jnp.dot(s, sphere_points.astype(jnp.float32) / float(S),
                   preferred_element_type=jnp.float32)


if __name__ == "__main__":
    num_channels = 32
    num_sphere_samples = 16
    num_atoms = 16

    key = jax.random.PRNGKey(0)
    k_x, k_sp, k_w1, k_b1, k_w2, k_b2, k_w3 = jax.random.split(key, 7)

    # Inputs
    x_pt = jax.random.normal(
        k_x, (num_atoms, num_sphere_samples, num_channels), dtype=jnp.float32)
    sphere_points = jax.random.normal(
        k_sp, (num_sphere_samples, 3), dtype=jnp.float32)

    # Deterministic synthetic parameters (shapes from nn.Linear in __init__).
    scale = 1.0 / jnp.sqrt(jnp.float32(num_channels))
    w1 = jax.random.normal(k_w1, (num_channels, num_channels), jnp.float32) * scale
    b1 = jax.random.normal(k_b1, (1, num_channels), jnp.float32) * scale
    w2 = jax.random.normal(k_w2, (num_channels, num_channels), jnp.float32) * scale
    b2 = jax.random.normal(k_b2, (1, num_channels), jnp.float32) * scale
    w3 = jax.random.normal(k_w3, (1, num_channels), jnp.float32) * scale  # fc3.weight
    params = (w1, b1, w2, b2, w3)

    # ---- f32 path: exact PyTorch semantics ----
    out = force_block_forward(x_pt, sphere_points, params)
    out = jax.block_until_ready(out)
    ref = _reference_f32(x_pt, sphere_points, params)
    assert out.shape == (num_atoms, 3)
    assert jnp.allclose(out, ref, atol=1e-5, rtol=1e-5), (
        f"f32 path: max abs err {jnp.max(jnp.abs(out - ref))}")

    # ---- bf16-operand perf path: validate vs matched-precision reference ----
    cfg = _hw_config()
    act_dt = _default_act_dtype(jnp.dtype(jnp.bfloat16), cfg)
    out_bf16 = force_block_forward(x_pt, sphere_points, params,
                                   compute_dtype=jnp.bfloat16, act_dtype=act_dt)
    out_bf16 = jax.block_until_ready(out_bf16)
    ref_bf16 = _reference_matched(x_pt, sphere_points, params, jnp.bfloat16, act_dt)
    assert jnp.allclose(out_bf16, ref_bf16, atol=2e-2, rtol=2e-2), (
        f"bf16 path vs matched ref: max abs err {jnp.max(jnp.abs(out_bf16 - ref_bf16))}")
    # Coarse sanity vs the full-f32 reference (bf16 operand/activation rounding).
    assert jnp.allclose(out_bf16, ref, atol=1e-1, rtol=1e-1), (
        f"bf16 path vs f32 ref: max abs err {jnp.max(jnp.abs(out_bf16 - ref))}")

    print("KERNEL_OK")
</pallas_src>

<mosaic_0001>
module attributes {stable_mosaic.version = 11 : i64} {
  func.func @_force_block_kernel(%arg0: i32, %arg1: memref<8x16x32xf32, #tpu.memory_space<vmem>>, %arg2: memref<64x32xf32, #tpu.memory_space<vmem>>, %arg3: memref<8x32xf32, #tpu.memory_space<vmem>>, %arg4: memref<16x128xf32, #tpu.memory_space<vmem>>, %arg5: memref<8x128xf32, #tpu.memory_space<vmem>>) attributes {dimension_semantics = [#tpu.dimension_semantics<parallel>], iteration_bounds = array<i64: 2>, scalar_prefetch = 0 : i64, scratch_operands = 0 : i64, tpu.core_type = #tpu.core_type<tc>, window_params = [{transform_indices = @transform_0, window_bounds = array<i64: 8, 16, 32>}, {pipeline_mode = #tpu.pipeline_mode<synchronous>, transform_indices = @transform_1, window_bounds = array<i64: 64, 32>}, {pipeline_mode = #tpu.pipeline_mode<synchronous>, transform_indices = @transform_2, window_bounds = array<i64: 8, 32>}, {pipeline_mode = #tpu.pipeline_mode<synchronous>, transform_indices = @transform_3, window_bounds = array<i64: 16, 128>}, {transform_indices = @transform_4, window_bounds = array<i64: 8, 128>}]} {
    %c0 = arith.constant 0 : index
    %c0_0 = arith.constant 0 : index
    %c0_1 = arith.constant 0 : index
    %0 = vector.load %arg1[%c0, %c0_0, %c0_1] : memref<8x16x32xf32, #tpu.memory_space<vmem>>, vector<8x16x32xf32>
    %1 = vector.shape_cast %0 : vector<8x16x32xf32> to vector<128x32xf32>
    %c0_2 = arith.constant 0 : index
    %c0_3 = arith.constant 0 : index
    %2 = vector.load %arg2[%c0_2, %c0_3] : memref<64x32xf32, #tpu.memory_space<vmem>>, vector<64x32xf32>
    %3 = vector.extract_strided_slice %2 {offsets = [0, 0], sizes = [32, 32], strides = [1, 1]} : vector<64x32xf32> to vector<32x32xf32>
    %4 = vector.extract_strided_slice %2 {offsets = [32, 0], sizes = [32, 32], strides = [1, 1]} : vector<64x32xf32> to vector<32x32xf32>
    %c0_4 = arith.constant 0 : index
    %c0_5 = arith.constant 0 : index
    %5 = vector.load %arg3[%c0_4, %c0_5] : memref<8x32xf32, #tpu.memory_space<vmem>>, vector<8x32xf32>
    %6 = vector.extract_strided_slice %5 {offsets = [0, 0], sizes = [1, 32], strides = [1, 1]} : vector<8x32xf32> to vector<1x32xf32>
    %7 = vector.extract_strided_slice %5 {offsets = [1, 0], sizes = [1, 32], strides = [1, 1]} : vector<8x32xf32> to vector<1x32xf32>
    %8 = vector.extract_strided_slice %5 {offsets = [2, 0], sizes = [1, 32], strides = [1, 1]} : vector<8x32xf32> to vector<1x32xf32>
    %cst = arith.constant dense<0.000000e+00> : vector<128x32xf32>
    %9 = tpu.matmul %1, %3, %cst {dimension_numbers = #tpu.dot_dimension_numbers<[1], [0], [0], [1], [0, 0, 1, 1], [], []>} : vector<128x32xf32>, vector<32x32xf32>, vector<128x32xf32> -> vector<128x32xf32>
    %10 = vector.broadcast %6 : vector<1x32xf32> to vector<128x32xf32>
    %11 = arith.addf %9, %10 : vector<128x32xf32>
    %12 = arith.negf %11 : vector<128x32xf32>
    %13 = math.exp %12 : vector<128x32xf32>
    %cst_6 = arith.constant 1.000000e+00 : f32
    %14 = vector.broadcast %cst_6 : f32 to vector<128x32xf32>
    %15 = arith.addf %14, %13 : vector<128x32xf32>
    %16 = arith.divf %14, %15 : vector<128x32xf32>
    %17 = arith.mulf %11, %16 : vector<128x32xf32>
    %cst_7 = arith.constant dense<0.000000e+00> : vector<128x32xf32>
    %18 = tpu.matmul %17, %4, %cst_7 {dimension_numbers = #tpu.dot_dimension_numbers<[1], [0], [0], [1], [0, 0, 1, 1], [], []>} : vector<128x32xf32>, vector<32x32xf32>, vector<128x32xf32> -> vector<128x32xf32>
    %19 = vector.broadcast %7 : vector<1x32xf32> to vector<128x32xf32>
    %20 = arith.addf %18, %19 : vector<128x32xf32>
    %21 = arith.negf %20 : vector<128x32xf32>
    %22 = math.exp %21 : vector<128x32xf32>
    %cst_8 = arith.constant 1.000000e+00 : f32
    %23 = vector.broadcast %cst_8 : f32 to vector<128x32xf32>
    %24 = arith.addf %23, %22 : vector<128x32xf32>
    %25 = arith.divf %23, %24 : vector<128x32xf32>
    %26 = arith.mulf %20, %25 : vector<128x32xf32>
    %27 = vector.broadcast %8 : vector<1x32xf32> to vector<128x32xf32>
    %28 = arith.mulf %26, %27 : vector<128x32xf32>
    %29 = vector.shape_cast %28 : vector<128x32xf32> to vector<8x16x32xf32>
    %cst_9 = arith.constant dense<0.000000e+00> : vector<8x16xf32>
    %30 = vector.multi_reduction <add>, %29, %cst_9 [2] : vector<8x16x32xf32> to vector<8x16xf32>
    %c0_10 = arith.constant 0 : index
    %c0_11 = arith.constant 0 : index
    %31 = vector.load %arg4[%c0_10, %c0_11] : memref<16x128xf32, #tpu.memory_space<vmem>>, vector<16x128xf32>
    %cst_12 = arith.constant dense<0.000000e+00> : vector<8x128xf32>
    %32 = tpu.matmul %30, %31, %cst_12 {dimension_numbers = #tpu.dot_dimension_numbers<[1], [0], [0], [1], [0, 0, 1, 1], [], []>} : vector<8x16xf32>, vector<16x128xf32>, vector<8x128xf32> -> vector<8x128xf32>
    %c0_13 = arith.constant 0 : index
    %c0_14 = arith.constant 0 : index
    %33 = vector.load %arg5[%c0_13, %c0_14] : memref<8x128xf32, #tpu.memory_space<vmem>>, vector<8x128xf32>
    tpu.vector_store %arg5[%c0_13, %c0_14], %32 {strides = array<i32>} : memref<8x128xf32, #tpu.memory_space<vmem>>, vector<8x128xf32>,
    return
  }
  func.func @transform_0(%arg0: i32) -> (i32, i32, i32) {
    %c0_i32 = arith.constant 0 : i32
    %c0_i32_0 = arith.constant 0 : i32
    %c0_i32_1 = arith.constant 0 : i32
    return %arg0, %c0_i32, %c0_i32_0 : i32, i32, i32
  }
  func.func @transform_1(%arg0: i32) -> (i32, i32) {
    %c0_i32 = arith.constant 0 : i32
    %c0_i32_0 = arith.constant 0 : i32
    %c0_i32_1 = arith.constant 0 : i32
    return %c0_i32, %c0_i32_0 : i32, i32
  }
  func.func @transform_2(%arg0: i32) -> (i32, i32) {
    %c0_i32 = arith.constant 0 : i32
    %c0_i32_0 = arith.constant 0 : i32
    %c0_i32_1 = arith.constant 0 : i32
    return %c0_i32, %c0_i32_0 : i32, i32
  }
  func.func @transform_3(%arg0: i32) -> (i32, i32) {
    %c0_i32 = arith.constant 0 : i32
    %c0_i32_0 = arith.constant 0 : i32
    %c0_i32_1 = arith.constant 0 : i32
    return %c0_i32, %c0_i32_0 : i32, i32
  }
  func.func @transform_4(%arg0: i32) -> (i32, i32) {
    %c0_i32 = arith.constant 0 : i32
    %c0_i32_0 = arith.constant 0 : i32
    return %arg0, %c0_i32 : i32, i32
  }
}

</mosaic_0001>

<bundles_post_ra>
// kernel: tpu_custom_call.1
= control target key start
LH: loop header
LB: loop body
LE: loop exit
PB: predicated region body
PF: predicated region fallthrough
CT: control target
= control target key end

     0   :  { %9 = vsyncpa [#allocation3], 0  ;;  %s2460_s0 = inlined_call_operand.hbm [shape: f32[16,16,32], index: 0, kind: input, shape index: {}]   ;;  %s2461_s1 = inlined_call_operand.hbm [shape: f32[64,32], index: 1, kind: input, shape index: {}]   ;;  %s2462_s2 = inlined_call_operand.hbm [shape: f32[8,32], index: 2, kind: input, shape index: {}]   ;;  %s2463_s3 = inlined_call_operand.hbm [shape: f32[16,128], index: 3, kind: input, shape index: {}]   ;;  %s2464_s4 = inlined_call_operand.hbm [shape: f32[16,128], index: 4, kind: output, shape index: {}]  }
   0x1   :  { %11 = vsyncpa [#allocation3 + $0x1], 0 }
   0x2   :  { %12 = vsyncpa [#allocation6], 0 }
   0x3   :  { %13 = vsyncpa [#allocation9], 0 }
   0x4   :  { %14 = vsyncpa [#allocation4], 0 }
   0x5   :  { %16 = vsyncpa [#allocation4 + $0x1], 0  ;;  %s1922_s15 = smov 0   ;;  %s1924_s16 = smov 0  }
   0x6   :  { %s1926_s17 = smov 0   ;;  %s1928_s18 = smov 0  }
   0x7 LB: > { %s1943_s19 = sadd.s32 4294967295, %s1885_s18   ;;  %s1267_s20 = sadd.s32 4294967294, %s1885_s18   ;;  %s1885_s18 = sphi %s1928_s18, %s2487_s18   ;;  %s1881_s17 = sphi %s1926_s17, %s2486_s17   ;;  %s1877_s16 = sphi %s1924_s16, %s2485_s16   ;;  %s1873_s15 = sphi %s1922_s15, %s2484_s15  }
   0x8   : > { %p42_p0 = scmp.ne.s32.totalorder %s1877_s16, %s1873_s15  ;;  %p2465_p1 = scmp.eq.s32.totalorder %s1943_s19, 0 }
   0x9   : > { %p135_p3 = scmp.eq.s32.totalorder %s1267_s20, 1  ;;  %p1268_p5 = scmp.ge.s32.totalorder %s1885_s18, 1 }
   0xa   : > { %p1952_p4 = por %p2465_p1, %p42_p0  ;;  %p142_p7 = scmp.lt.s32.totalorder %s1885_s18, 3 }
   0xb   : > { %p1957_p6 = por %p135_p3, %p42_p0  ;;  %s1887_s24 = smov [#allocation5]  }
   0xc   : > { %s2468_s21 = scalar_select %p1952_p4, 1, 0 }
   0xd   : > { %s2469_s22 = scalar_select %p1957_p6, 1, 0 }
   0xe   : > { %p1962_p8 = pnand %p1268_p5, %p142_p7  ;;  %s154_s25 = sshll.u32 %s1887_s24, 4  ;;  %s1966_s25 = int_to_ptr.vmem [resolvable:$true] %s154_s25 }
   0xf   : > { %s1888_s27 = smov [#allocation7]   ;;  %s1889_s29 = smov [#allocation8]  }
  0x10   : > { %s2470_s23 = scalar_select %p1962_p8, 1, 0 }
  0x11   : > { %p1503_p9 = pneg %p1962_p8  ;;  %s168_s28 = sshll.u32 %s1888_s27, 4  ;;  %s1977_s28 = int_to_ptr.vmem [resolvable:$true] %s168_s28 }
  0x12   : > { %s1979_s30 = sshll.u32 %s1889_s29, 4  ;;  %s1697_s7 = scalar_lea.hbm %s2461_s1, 1024  ;;  %s179_s30 = int_to_ptr.vmem [resolvable:$true] %s1979_s30 }
  0x13   : > { %p1973_p11 = pnand %p1503_p9, %p2465_p1  ;;  %p1698_p12 = scmp.ne.s32.totalorder %s2461_s1, %s1697_s7 }
  0x14   : > { %p1704_p5 = scmp.lt.u32.totalorder %s1697_s7, %s2461_s1 }
  0x15   : > { %p1989_p13 = pneg %p1973_p11 }
  0x17   : > { %p1700_p0 = pnand %p1989_p13, %p1698_p12 }
  0x19   : > { %p1701_p3 = pneg %p1700_p0 }
  0x1b   : > { %p1706_p7 = pnand %p1704_p5, %p1701_p3 }
  0x1d   : > { %1709 = shalt.err (!%p1706_p7)
}
  0x1e   : > { %s1710_s13 = scalar_lea.vmem %s1966_s25, 1024  ;;  %p1718_p2 = scmp.lt.s32.totalorder %s1966_s25, %s1966_s25 }
  0x1f   : > { %p1711_p9 = scmp.ne.s32.totalorder %s1966_s25, %s1710_s13  ;;  %p1719_p6 = scmp.lt.s32.totalorder %s1710_s13, %s1710_s13 }
  0x21   : > { %p1713_p10 = pnand %p1711_p9, %p1989_p13  ;;  %p1720_p12 = por %p1719_p6, %p1718_p2 }
  0x23   : > { %p1714_p1 = pneg %p1713_p10 }
  0x25   : > { %p1721_p0 = pnand %p1720_p12, %p1714_p1 }
  0x27   : > { %1724 = shalt.err (!%p1721_p0)
}
  0x28   : > { %s1890_s14 = smov 128   ;;  %s1891_s20 = smov 8  }
  0x29   : > { %1506 = dma.hbm_to_vmem [thread:$0]  (!%p1973_p11), %s2461_s1, 1024, %s1966_s25, [#allocation6], %s1890_s14, %s1890_s14, %s1891_s20  }
  0x2a   : > { %s1725_s6 = scalar_lea.hbm %s2462_s2, 128 }
  0x2b   : > { %p1726_p1 = scmp.ne.s32.totalorder %s2462_s2, %s1725_s6  ;;  %p1732_p10 = scmp.lt.u32.totalorder %s1725_s6, %s2462_s2 }
  0x2d   : > { %p1728_p2 = pnand %p1726_p1, %p1989_p13 }
  0x2f   : > { %p1729_p6 = pneg %p1728_p2 }
  0x31   : > { %p1734_p3 = pnand %p1732_p10, %p1729_p6 }
  0x33   : > { %1737 = shalt.err (!%p1734_p3)
}
  0x34   : > { %s1738_s25 = scalar_lea.vmem %s1977_s28, 128  ;;  %p1746_p12 = scmp.lt.s32.totalorder %s1977_s28, %s1977_s28 }
  0x35   : > { %p1739_p5 = scmp.ne.s32.totalorder %s1977_s28, %s1738_s25  ;;  %p1747_p0 = scmp.lt.s32.totalorder %s1738_s25, %s1738_s25 }
  0x37   : > { %p1741_p7 = pnand %p1739_p5, %p1989_p13  ;;  %p1748_p1 = por %p1747_p0, %p1746_p12 }
  0x39   : > { %p1742_p9 = pneg %p1741_p7 }
  0x3b   : > { %p1749_p2 = pnand %p1748_p1, %p1742_p9 }
  0x3d   : > { %1752 = shalt.err (!%p1749_p2)
}
  0x3e   : > { %1509 = dma.hbm_to_vmem [thread:$0]  (!%p1973_p11), %s2462_s2, 128, %s1977_s28, [#allocation6]  }
  0x3f   : > { %s1753_s29 = scalar_lea.hbm %s2463_s3, 256 }
  0x40   : > { %p1754_p6 = scmp.ne.s32.totalorder %s2463_s3, %s1753_s29  ;;  %p1760_p5 = scmp.lt.u32.totalorder %s1753_s29, %s2463_s3 }
  0x42   : > { %p1756_p10 = pnand %p1754_p6, %p1989_p13 }
  0x44   : > { %p1757_p3 = pneg %p1756_p10 }
  0x46   : > { %p1762_p7 = pnand %p1760_p5, %p1757_p3 }
  0x48   : > { %1765 = shalt.err (!%p1762_p7)
}
  0x49   : > { %s1766_s9 = scalar_lea.vmem %s179_s30, 256  ;;  %p1774_p1 = scmp.lt.s32.totalorder %s179_s30, %s179_s30 }
  0x4a   : > { %p1767_p9 = scmp.ne.s32.totalorder %s179_s30, %s1766_s9  ;;  %p1775_p2 = scmp.lt.s32.totalorder %s1766_s9, %s1766_s9 }
  0x4c   : > { %p1769_p12 = pnand %p1767_p9, %p1989_p13  ;;  %p1776_p4 = por %p1775_p2, %p1774_p1 }
  0x4e   : > { %p1770_p0 = pneg %p1769_p12 }
  0x50   : > { %p1777_p8 = pnand %p1776_p4, %p1770_p0 }
  0x52   : > { %1780 = shalt.err (!%p1777_p8)
}
  0x53   : > { %1512 = dma.hbm_to_vmem [thread:$0]  (!%p1973_p11), %s2463_s3, 256, %s179_s30, [#allocation9], %s1890_s14, %s1890_s14, %s1891_s20  }
  0x54   : > { %s2059_s10 = sadd.s32 1, %s1885_s18   ;;  %s29_s25 = sadd.s32 1, %s1881_s17 }
  0x55   : > { %s26_s26 = ssub.s32 %s1885_s18, %s2059_s10  ;;  %p36_p8 = scmp.ne.s32.totalorder %s1881_s17, %s1877_s16 }
  0x56   : > { %p27_p4 = scmp.eq.s32.totalorder %s26_s26, 0  ;;  %p37_p13 = scmp.eq.s32.totalorder %s1885_s18, 0 }
  0x57   : > { %p1524_p6 = scmp.lt.s32.totalorder %s1885_s18, 2  ;;  %p2473_p3 = scmp.eq.s32.totalorder %s1943_s19, 1 }
  0x58   : > { %s2069_s12 = scalar_select %p27_p4, %s1881_s17, %s29_s25  }
  0x59   : > { %p38_p10 = por %p37_p13, %p36_p8  ;;  %p2073_p5 = por %p2473_p3, %p36_p8 }
  0x5a   : > { %s192_s24 = sand.u32 1, %s1881_s17   ;;  %s1353_s27 = sshll.u32 %s1885_s18, 11 }
  0x5b   : > { %s1273_s30 = sshll.u32 %s192_s24, 7  ;;  %s2082_s6 = scalar_lea.hbm %s2460_s0, %s1353_s27 }
  0x5c   : > { %s196_s7 = scalar_lea.vmem [#allocation2], %s1273_s30  ;;  %p2084_p11 = pnand %p1524_p6, %p38_p10 }
  0x5d   : > { %s204_s8 = sshll.u32 %s196_s7, 4  ;;  %s2090_s28 = scalar_lea.sflag [#allocation3], %s192_s24  ;;  %s2088_s8 = int_to_ptr.vmem [resolvable:$true] %s204_s8 }
  0x5e   : > { %s1781_s11 = scalar_lea.hbm %s2082_s6, 2048  ;;  %p1783_p9 = pneg %p2084_p11 }
  0x5f   : > { %p1782_p7 = scmp.ne.s32.totalorder %s2082_s6, %s1781_s11  ;;  %s1786_s27 = scalar_lea.hbm %s2460_s0, 4096 }
  0x60   : > { %p1787_p1 = scmp.lt.u32.totalorder %s2082_s6, %s2460_s0  ;;  %p1788_p2 = scmp.lt.u32.totalorder %s1786_s27, %s1781_s11 }
  0x61   : > { %p1784_p12 = pnand %p1783_p9, %p1782_p7  ;;  %p1790_p8 = scmp.lt.u32.totalorder %s1781_s11, %s2082_s6 }
  0x62   : > { %p1789_p4 = por %p1788_p2, %p1787_p1 }
  0x63   : > { %p1785_p0 = pneg %p1784_p12 }
  0x64   : > { %p1791_p13 = por %p1790_p8, %p1789_p4 }
  0x66   : > { %p1792_p6 = pnand %p1791_p13, %p1785_p0 }
  0x68   : > { %1795 = shalt.err (!%p1792_p6)
}
  0x69   : > { %s1796_s24 = scalar_lea.vmem %s2088_s8, 2048  ;;  %s1892_s5 = smov [#allocation2]  }
  0x6a   : > { %p1797_p10 = scmp.ne.s32.totalorder %s2088_s8, %s1796_s24  ;;  %s1801_s7 = sshll.u32 %s1892_s5, 4  ;;  %s1802_s7 = int_to_ptr.vmem [resolvable:$false] %s1801_s7 }
  0x6b   : > { %s1803_s26 = scalar_lea.vmem %s1802_s7, 4096  ;;  %p1804_p12 = scmp.lt.s32.totalorder %s2088_s8, %s1802_s7 }
  0x6c   : > { %p1799_p3 = pnand %p1797_p10, %p1783_p9  ;;  %p1805_p1 = scmp.lt.s32.totalorder %s1803_s26, %s1796_s24 }
  0x6e   : > { %p1800_p7 = pneg %p1799_p3  ;;  %p1806_p2 = por %p1805_p1, %p1804_p12 }
  0x70   : > { %p1807_p4 = pnand %p1806_p2, %p1800_p7 }
  0x72   : > { %1810 = shalt.err (!%p1807_p4)
}
  0x73   : > { %1516 = dma.hbm_to_vmem [thread:$0]  (!%p2084_p11), %s2082_s6, 2048, %s2088_s8, %s2090_s28, %s1890_s14, %s1890_s14, %s1891_s20  }
  0x74   : > { %p2476_p9 = scmp.ne.s32.totalorder %s2470_s23, 0 }
  0x75   : > { %s2124_s11 = sand.u32 (!%p2476_p9), 1, %s1877_s16   ;;  %p2477_p0 = scmp.ne.s32.totalorder (!%p2476_p9), %s2468_s21, 0 }
  0x76   : > { %216 = sbr.rel (%p2476_p9) target bundleno = 1037 (0x40d), region = 36  ;;  %s1278_s25 = sshll.u32 (!%p2476_p9), %s2124_s11, 7 }
  0x77   : > { %s219_s27 = scalar_lea.sflag (!%p2476_p9), [#allocation3], %s2124_s11  ;;  %s2128_s30 = scalar_lea.vmem (!%p2476_p9), [#allocation2], %s1278_s25 }
  0x7d   : > { %1856 = dma.done.wait (%p2477_p0), %s219_s27, 2048  }
  0x7e   : > { %1858 = vsyncadd (%p2477_p0), %s219_s27, 4294965248  ;;  %p2478_p11 = scmp.eq.s32.totalorder %s1943_s19, 0 }
  0x80   : > { %1860 = dma.done.wait (%p2478_p11), [#allocation6], 1152   ;;  %p2479_p8 = pmov %p2478_p11 }
  0x82   : > { %1862 = vsyncadd (%p2479_p8), [#allocation6], 4294966144  ;;  %p2480_p13 = pmov %p2479_p8 }
  0x83   : > { %p2481_p6 = pmov %p2479_p8 }
  0x84   : > { %1864 = dma.done.wait (%p2480_p13), [#allocation9], 256  }
  0x85   : > { %1866 = vsyncadd (%p2481_p6), [#allocation9], 4294967040  ;;  %vm289_vm0 = vcmask 261120   ;;  %v276_v0 = vld [vmem:[#allocation5] sm:$0xff]  ;;  %v277_v1 = vld [vmem:[#allocation5 + $0x8] sm:$0xff]  ;;  %v285_v28 = vlaneseq  ;;  %vm1894_vm1 = vmmov 0  }
  0x86   : > { %v278_v2 = vld [vmem:[#allocation5 + $0x10] sm:$0xff]  ;;  %v1468_v3 = vpack.c.bf16 %v277_v1, %v276_v0  ;;  %v279_v4 = vld [vmem:[#allocation5 + $0x18] sm:$0xff]  ;;  %v260_v5 = vld [vmem:[%s2128_s30] sm:$0xff]  ;;  %vm1001_vm2 = vcmask 130112   ;;  %vm1066_vm3 = vcmask 1041409   ;;  %vm1068_vm4 = vcmask 1042434  }
  0x87   : > { %v1472_v6 = vpack.c.bf16 %v279_v4, %v278_v2  ;;  %1405 = vmatprep.mubr.msk.f32.mxu0 %vm289_vm0, %v260_v5  ;;  %v261_v7 = vld [vmem:[%s2128_s30 + $0x8] sm:$0xff]  ;;  %v262_v8 = vld [vmem:[%s2128_s30 + $0x10] sm:$0xff]  ;;  %v263_v9 = vld [vmem:[%s2128_s30 + $0x18] sm:$0xff]  ;;  %v2175_v29 = vshrl.u32 %v285_v28, 7  ;;  %vm1070_vm5 = vcmask 1043459   ;;  %vm1072_vm6 = vcmask 1044484  }
  0x88   : > { %1469 = vmatprep.subr.bf16.mxu0 %v1468_v3  ;;  %v264_v10 = vld [vmem:[%s2128_s30 + $0x20] sm:$0xff]  ;;  %v265_v11 = vld [vmem:[%s2128_s30 + $0x28] sm:$0xff]  ;;  %v266_v12 = vld [vmem:[%s2128_s30 + $0x30] sm:$0xff]  ;;  %vm1074_vm7 = vcmask 1045509   ;;  %vm1076_vm8 = vcmask 1046534   ;;  %vm1078_vm9 = vcmask 1047559  }
  0x89   : > { %1471 = vmatpush3.bf16.msra.mxu0 %v1468_v3  ;;  %v267_v13 = vld [vmem:[%s2128_s30 + $0x38] sm:$0xff]  ;;  %v268_v14 = vld [vmem:[%s2128_s30 + $0x40] sm:$0xff]  ;;  %v269_v15 = vld [vmem:[%s2128_s30 + $0x48] sm:$0xff]  ;;  %v287_v30 = vsub.s32 0, %v2175_v29  ;;  %vm1080_vm10 = vcmask 130048   ;;  %s1282_s21 = sshll.u32 %s2124_s11, 3 }
  0x8a   : > { %1473 = vmatprep.subr.bf16.mxu0 %v1472_v6  ;;  %v270_v16 = vld [vmem:[%s2128_s30 + $0x50] sm:$0xff]  ;;  %v271_v17 = vld [vmem:[%s2128_s30 + $0x58] sm:$0xff]  ;;  %v272_v18 = vld [vmem:[%s2128_s30 + $0x60] sm:$0xff]  ;;  %s258_s23 = scalar_lea.vmem [#allocation10], %s1282_s21  ;;  %s1349_s20 = sshll.u32 %s1943_s19, 7 }
  0x8b   : > { %v273_v19 = vld [vmem:[%s2128_s30 + $0x68] sm:$0xff]  ;;  %v274_v20 = vld [vmem:[%s2128_s30 + $0x70] sm:$0xff]  ;;  %v275_v21 = vld [vmem:[%s2128_s30 + $0x78] sm:$0xff]  ;;  %s1168_s14 = sshll.u32 %s258_s23, 4  ;;  %s2418_s9 = scalar_lea.hbm %s2464_s4, %s1349_s20  ;;  %s2413_s14 = int_to_ptr.vmem [resolvable:$true] %s1168_s14 }
  0x8c   : > { %v280_v22 = vld [vmem:[#allocation5 + $0x20] sm:$0xff]  ;;  %v281_v23 = vld [vmem:[#allocation5 + $0x28] sm:$0xff]  ;;  %v282_v25 = vld [vmem:[#allocation5 + $0x30] sm:$0xff]  ;;  %s1155_s28 = scalar_lea.sflag [#allocation4], %s2124_s11  ;;  %s1811_s29 = scalar_lea.vmem %s2413_s14, 128 }
  0x8d   : > { %1475 = vmatpush3.bf16.msra.mxu0 %v1472_v6  ;;  %v1476_v24 = vpack.c.bf16 %v281_v23, %v280_v22  ;;  %v283_v26 = vld [vmem:[#allocation5 + $0x38] sm:$0xff]  ;;  %v2178_v31 = vld [vmem:[#allocation7] sm:$0xff]  ;;  %p1812_p10 = scmp.ne.s32.totalorder %s2413_s14, %s1811_s29  ;;  %s1896_s19 = smov [#allocation10]  }
  0x8e   : > { %v1480_v27 = vpack.c.bf16 %v283_v26, %v282_v25  ;;  %v2181_v32 = vrot.slane %v2178_v31, %v287_v30  ;;  %s1815_s24 = sshll.u32 %s1896_s19, 4  ;;  %s1816_s24 = int_to_ptr.vmem [resolvable:$false] %s1815_s24 }
  0x8f   : > { %1477 = vmatprep.subr.bf16.mxu1 %v1476_v24  ;;  %p1813_p3 = pnand %p1812_p10, %p2073_p5  ;;  %s1817_s5 = scalar_lea.vmem %s1816_s24, 256 }
  0x90   : > { %1406 = vmatmul.mubr.msk.f32.vlgmr.msra.gmra.mrb[0].mxu0 %vm289_vm0, %v261_v7  ;;  %1479 = vmatpush3.bf16.msra.mxu1 %v1476_v24  ;;  %p1818_p12 = scmp.lt.s32.totalorder %s2413_s14, %s1816_s24  ;;  %p1819_p1 = scmp.lt.s32.totalorder %s1817_s5, %s1811_s29 }
  0x91   : > { %1408 = vmatprep.mubr.msk.f32.mxu0 %vm289_vm0, %v262_v8  ;;  %1481 = vmatprep.subr.bf16.mxu1 %v1480_v27  ;;  %p1814_p7 = pneg %p1813_p3 }
  0x92   : > { %p1820_p2 = por %p1819_p1, %p1818_p12 }
  0x94   : > { %1409 = vmatmul.mubr.msk.f32.gmra.mrb[2].mxu0 %vm289_vm0, %v263_v9  ;;  %1483 = vmatpush3.bf16.msra.mxu1 %v1480_v27  ;;  %p1821_p4 = pnand %p1820_p2, %p1814_p7 }
  0x95   : > { %1411 = vmatprep.mubr.msk.f32.mxu0 %vm289_vm0, %v264_v10 }
  0x98   : > { %1412 = vmatmul.mubr.msk.f32.gmra.mrb[4].mxu0 %vm289_vm0, %v265_v11 }
  0x99   : > { %1414 = vmatprep.mubr.msk.f32.mxu0 %vm289_vm0, %v266_v12 }
  0x9c   : > { %1415 = vmatmul.mubr.msk.f32.gmra.mrb[6].mxu0 %vm289_vm0, %v267_v13 }
  0x9d   : > { %1417 = vmatprep.mubr.msk.f32.mxu0 %vm289_vm0, %v268_v14 }
  0xa0   : > { %1418 = vmatmul.mubr.msk.f32.gmra.mrb[8].mxu0 %vm289_vm0, %v269_v15 }
  0xa1   : > { %1420 = vmatprep.mubr.msk.f32.mxu0 %vm289_vm0, %v270_v16 }
  0xa4   : > { %1421 = vmatmul.mubr.msk.f32.gmra.mrb[10].mxu0 %vm289_vm0, %v271_v17 }
  0xa5   : > { %1423 = vmatprep.mubr.msk.f32.mxu0 %vm289_vm0, %v272_v18 }
  0xa8   : > { %1424 = vmatmul.mubr.msk.f32.gmra.mrb[12].mxu0 %vm289_vm0, %v273_v19 }
  0xa9   : > { %1426 = vmatprep.mubr.msk.f32.mxu0 %vm289_vm0, %v274_v20 }
  0xac   : > { %1427 = vmatmul.mubr.msk.f32.gmra.mrb[14].mxu0 %vm289_vm0, %v275_v21 }
 0x163   : > { %v1407_v33 = vpop.f32.mrb[0].mxu0 }
 0x164   : > { %v2184_v34 = vadd.f32 %v1407_v33, %v2181_v32  ;;  %v404_v35 = vpop.f32.mrb[1].mxu0 }
 0x165   : > { %v2187_v36 = vadd.f32 %v404_v35, %v2181_v32 }
 0x166   : > { %v1300_v37 = vmul.f32 -1.442695, %v2184_v34 }
 0x167   : > { %v1299_v38 = vmul.f32 -1.442695, %v2187_v36  ;;  %v1410_v39 = vpop.f32.mrb[2].mxu0 }
 0x168   : > { %1569 = vpow2.f32 %v1300_v37  ;;  %v2192_v40 = vadd.f32 %v1410_v39, %v2181_v32  ;;  %v414_v41 = vpop.f32.mrb[3].mxu0 }
 0x169   : > { %1571 = vpow2.f32 %v1299_v38  ;;  %v2195_v42 = vadd.f32 %v414_v41, %v2181_v32 }
 0x16a   : > { %v1302_v43 = vmul.f32 -1.442695, %v2192_v40 }
 0x16b   : > { %v1301_v44 = vmul.f32 -1.442695, %v2195_v42  ;;  %v1413_v45 = vpop.f32.mrb[4].mxu0 }
 0x16c   : > { %1573 = vpow2.f32 %v1302_v43  ;;  %v2200_v46 = vadd.f32 %v1413_v45, %v2181_v32  ;;  %v424_v47 = vpop.f32.mrb[5].mxu0 }
 0x16d   : > { %1575 = vpow2.f32 %v1301_v44  ;;  %v2203_v48 = vadd.f32 %v424_v47, %v2181_v32 }
 0x16e   : > { %v1304_v49 = vmul.f32 -1.442695, %v2200_v46 }
 0x16f   : > { %v1303_v50 = vmul.f32 -1.442695, %v2203_v48  ;;  %v1416_v51 = vpop.f32.mrb[6].mxu0 }
 0x170   : > { %1577 = vpow2.f32 %v1304_v49  ;;  %v2208_v52 = vadd.f32 %v1416_v51, %v2181_v32  ;;  %v434_v53 = vpop.f32.mrb[7].mxu0 }
 0x171   : > { %1579 = vpow2.f32 %v1303_v50  ;;  %v2211_v54 = vadd.f32 %v434_v53, %v2181_v32 }
 0x172   : > { %v1570_v55 = vpop.eup %1569  ;;  %v1306_v56 = vmul.f32 -1.442695, %v2208_v52 }
 0x173   : > { %v1572_v57 = vpop.eup %1571  ;;  %v532_v58 = vadd.f32 1.0, %v1570_v55  ;;  %v1305_v59 = vmul.f32 -1.442695, %v2211_v54  ;;  %v1419_v60 = vpop.f32.mrb[8].mxu0 }
 0x174   : > { %v531_v61 = vadd.f32 1.0, %v1572_v57  ;;  %1581 = vpow2.f32 %v1306_v56  ;;  %v2216_v62 = vadd.f32 %v1419_v60, %v2181_v32  ;;  %v444_v63 = vpop.f32.mrb[9].mxu0 }
 0x175   : > { %1583 = vrcp.f32 %v532_v58  ;;  %v2219_v0 = vadd.f32 %v444_v63, %v2181_v32 }
 0x176   : > { %v1574_v1 = vpop.eup %1573  ;;  %1585 = vrcp.f32 %v531_v61  ;;  %v1308_v2 = vmul.f32 -1.442695, %v2216_v62 }
 0x177   : > { %v1576_v3 = vpop.eup %1575  ;;  %v534_v4 = vadd.f32 1.0, %v1574_v1  ;;  %1587 = vpow2.f32 %v1305_v59  ;;  %v1307_v5 = vmul.f32 -1.442695, %v2219_v0  ;;  %v1422_v6 = vpop.f32.mrb[10].mxu0 }
 0x178   : > { %v533_v7 = vadd.f32 1.0, %v1576_v3  ;;  %1589 = vpow2.f32 %v1308_v2  ;;  %v2224_v8 = vadd.f32 %v1422_v6, %v2181_v32  ;;  %v454_v9 = vpop.f32.mrb[11].mxu0 }
 0x179   : > { %1591 = vrcp.f32 %v534_v4  ;;  %v2227_v10 = vadd.f32 %v454_v9, %v2181_v32 }
 0x17a   : > { %v1578_v11 = vpop.eup %1577  ;;  %1593 = vrcp.f32 %v533_v7  ;;  %v1310_v12 = vmul.f32 -1.442695, %v2224_v8 }
 0x17b   : > { %v1580_v13 = vpop.eup %1579  ;;  %v536_v14 = vadd.f32 1.0, %v1578_v11  ;;  %1595 = vpow2.f32 %v1307_v5  ;;  %v1309_v15 = vmul.f32 -1.442695, %v2227_v10  ;;  %v1425_v16 = vpop.f32.mrb[12].mxu0 }
 0x17c   : > { %v535_v17 = vadd.f32 1.0, %v1580_v13  ;;  %1597 = vpow2.f32 %v1310_v12  ;;  %v2232_v18 = vadd.f32 %v1425_v16, %v2181_v32  ;;  %v464_v19 = vpop.f32.mrb[13].mxu0 }
 0x17d   : > { %1599 = vrcp.f32 %v536_v14  ;;  %v2235_v20 = vadd.f32 %v464_v19, %v2181_v32 }
 0x17e   : > { %v1582_v21 = vpop.eup %1581  ;;  %1601 = vrcp.f32 %v535_v17  ;;  %v1312_v22 = vmul.f32 -1.442695, %v2232_v18 }
 0x17f   : > { %v1584_v23 = vpop.eup %1583  ;;  %v538_v24 = vadd.f32 1.0, %v1582_v21  ;;  %1603 = vpow2.f32 %v1309_v15  ;;  %v1311_v25 = vmul.f32 -1.442695, %v2235_v20  ;;  %v1428_v26 = vpop.f32.mrb[14].mxu0 }
 0x180   : > { %v1586_v27 = vpop.eup %1585  ;;  %1605 = vpow2.f32 %v1312_v22  ;;  %v2240_v30 = vadd.f32 %v1428_v26, %v2181_v32  ;;  %v474_v33 = vpop.f32.mrb[15].mxu0  ;;  %v580_v41 = vmul.f32 %v1584_v23, %v2184_v34 }
 0x181   : > { %v1588_v35 = vpop.eup %1587  ;;  %v2243_v37 = vadd.f32 %v474_v33, %v2181_v32  ;;  %v579_v38 = vmul.f32 %v1586_v27, %v2187_v36  ;;  %1607 = vpow2.f32 %v1311_v25 }
 0x182   : > { %v1590_v39 = vpop.eup %1589  ;;  %v537_v43 = vadd.f32 1.0, %v1588_v35  ;;  %v1314_v44 = vmul.f32 -1.442695, %v2240_v30  ;;  %1609 = vrcp.f32 %v538_v24 }
 0x183   : > { %v1592_v45 = vpop.eup %1591  ;;  %v540_v47 = vadd.f32 1.0, %v1590_v39  ;;  %v1313_v49 = vmul.f32 -1.442695, %v2243_v37  ;;  %1437 = vmatprep.mubr.msk.f32.mxu1 %vm289_vm0, %v579_v38 }
 0x184   : > { %v1594_v50 = vpop.eup %1593  ;;  %1611 = vrcp.f32 %v537_v43  ;;  %1438 = vmatmul.mubr.msk.f32.vlgmr.msra.gmra.mrb[0].mxu1 %vm289_vm0, %v580_v41  ;;  %v582_v51 = vmul.f32 %v1592_v45, %v2192_v40 }
 0x185   : > { %v1596_v32 = vpop.eup %1595  ;;  %v581_v36 = vmul.f32 %v1594_v50, %v2195_v42  ;;  %1613 = vrcp.f32 %v540_v47 }
 0x186   : > { %v1598_v34 = vpop.eup %1597  ;;  %v539_v53 = vadd.f32 1.0, %v1596_v32  ;;  %1615 = vpow2.f32 %v1314_v44 }
 0x187   : > { %v1600_v55 = vpop.eup %1599  ;;  %v542_v56 = vadd.f32 1.0, %v1598_v34  ;;  %1617 = vpow2.f32 %v1313_v49  ;;  %1440 = vmatprep.mubr.msk.f32.mxu1 %vm289_vm0, %v581_v36 }
 0x188   : > { %v1602_v57 = vpop.eup %1601  ;;  %1619 = vrcp.f32 %v539_v53  ;;  %1441 = vmatmul.mubr.msk.f32.gmra.mrb[2].mxu1 %vm289_vm0, %v582_v51  ;;  %v584_v42 = vmul.f32 %v1600_v55, %v2200_v46 }
 0x189   : > { %v1604_v58 = vpop.eup %1603  ;;  %v583_v59 = vmul.f32 %v1602_v57, %v2203_v48  ;;  %1621 = vrcp.f32 %v542_v56 }
 0x18a   : > { %v1606_v60 = vpop.eup %1605  ;;  %v541_v61 = vadd.f32 1.0, %v1604_v58 }
 0x18b   : > { %v544_v40 = vadd.f32 1.0, %v1606_v60  ;;  %1443 = vmatprep.mubr.msk.f32.mxu1 %vm289_vm0, %v583_v59  ;;  %v1608_v63 = vpop.eup %1607 }
 0x18c   : > { %1623 = vrcp.f32 %v541_v61  ;;  %1444 = vmatmul.mubr.msk.f32.gmra.mrb[4].mxu1 %vm289_vm0, %v584_v42  ;;  %v1610_v1 = vpop.eup %1609  ;;  %v543_v2 = vadd.f32 1.0, %v1608_v63 }
 0x18d   : > { %1625 = vrcp.f32 %v544_v40  ;;  %v586_v46 = vmul.f32 %v1610_v1, %v2208_v52 }
 0x18e   : > { %v1612_v3 = vpop.eup %1611  ;;  %1627 = vrcp.f32 %v543_v2 }
 0x18f   : > { %v1614_v4 = vpop.eup %1613  ;;  %v585_v5 = vmul.f32 %v1612_v3, %v2211_v54 }
 0x190   : > { %v1616_v48 = vpop.eup %1615  ;;  %v588_v13 = vmul.f32 %v1614_v4, %v2216_v62 }
 0x191   : > { %v1618_v6 = vpop.eup %1617  ;;  %v546_v7 = vadd.f32 1.0, %v1616_v48  ;;  %1446 = vmatprep.mubr.msk.f32.mxu1 %vm289_vm0, %v585_v5 }
 0x192   : > { %v1620_v9 = vpop.eup %1619  ;;  %v545_v11 = vadd.f32 1.0, %v1618_v6  ;;  %1447 = vmatmul.mubr.msk.f32.gmra.mrb[6].mxu1 %vm289_vm0, %v586_v46 }
 0x193   : > { %v587_v12 = vmul.f32 %v1620_v9, %v2219_v0  ;;  %1629 = vrcp.f32 %v546_v7  ;;  %v1622_v14 = vpop.eup %1621  ;;  %v906_v7 = vsub.s32 2, %v2175_v29 }
 0x194   : > { %1631 = vrcp.f32 %v545_v11  ;;  %v590_v16 = vmul.f32 %v1622_v14, %v2224_v8  ;;  %v597_v8 = vsub.s32 1, %v2175_v29 }
 0x195   : > { %1449 = vmatprep.mubr.msk.f32.mxu1 %vm289_vm0, %v587_v12 }
 0x196   : > { %v1624_v54 = vpop.eup %1623  ;;  %1450 = vmatmul.mubr.msk.f32.gmra.mrb[8].mxu1 %vm289_vm0, %v588_v13 }
 0x197   : > { %v589_v52 = vmul.f32 %v1624_v54, %v2227_v10  ;;  %v1626_v15 = vpop.eup %1625 }
 0x198   : > { %v1628_v17 = vpop.eup %1627  ;;  %v592_v62 = vmul.f32 %v1626_v15, %v2232_v18 }
 0x199   : > { %1452 = vmatprep.mubr.msk.f32.mxu1 %vm289_vm0, %v589_v52  ;;  %v591_v0 = vmul.f32 %v1628_v17, %v2235_v20  ;;  %v2281_v20 = vrot.slane %v2178_v31, %v597_v8  ;;  %v2336_v17 = vrot.slane %v2178_v31, %v906_v7 }
 0x19a   : > { %1453 = vmatmul.mubr.msk.f32.gmra.mrb[10].mxu1 %vm289_vm0, %v590_v16 }
 0x19b   : > { %1455 = vmatprep.mubr.msk.f32.mxu1 %vm289_vm0, %v591_v0 }
 0x19d   : > { %v1630_v19 = vpop.eup %1629 }
 0x19e   : > { %v1632_v21 = vpop.eup %1631  ;;  %1456 = vmatmul.mubr.msk.f32.gmra.mrb[12].mxu1 %vm289_vm0, %v592_v62  ;;  %v594_v22 = vmul.f32 %v1630_v19, %v2240_v30 }
 0x19f   : > { %v593_v10 = vmul.f32 %v1632_v21, %v2243_v37 }
 0x1a1   : > { %1458 = vmatprep.mubr.msk.f32.mxu1 %vm289_vm0, %v593_v10 }
 0x1a2   : > { %1459 = vmatmul.mubr.msk.f32.gmra.mrb[14].mxu1 %vm289_vm0, %v594_v22 }
 0x257   : > { %v1439_v18 = vpop.f32.mrb[0].mxu1 }
 0x258   : > { %v2284_v23 = vadd.f32 %v1439_v18, %v2281_v20  ;;  %v713_v24 = vpop.f32.mrb[1].mxu1 }
 0x259   : > { %v2287_v25 = vadd.f32 %v713_v24, %v2281_v20 }
 0x25a   : > { %v1332_v26 = vmul.f32 -1.442695, %v2284_v23 }
 0x25b   : > { %v1331_v27 = vmul.f32 -1.442695, %v2287_v25  ;;  %v1442_v30 = vpop.f32.mrb[2].mxu1 }
 0x25c   : > { %1633 = vpow2.f32 %v1332_v26  ;;  %v2292_v33 = vadd.f32 %v1442_v30, %v2281_v20  ;;  %v723_v35 = vpop.f32.mrb[3].mxu1 }
 0x25d   : > { %1635 = vpow2.f32 %v1331_v27  ;;  %v2295_v37 = vadd.f32 %v723_v35, %v2281_v20 }
 0x25e   : > { %v1334_v38 = vmul.f32 -1.442695, %v2292_v33 }
 0x25f   : > { %v1333_v39 = vmul.f32 -1.442695, %v2295_v37  ;;  %v1445_v41 = vpop.f32.mrb[4].mxu1 }
 0x260   : > { %1637 = vpow2.f32 %v1334_v38  ;;  %v2300_v43 = vadd.f32 %v1445_v41, %v2281_v20  ;;  %v733_v44 = vpop.f32.mrb[5].mxu1 }
 0x261   : > { %1639 = vpow2.f32 %v1333_v39  ;;  %v2303_v45 = vadd.f32 %v733_v44, %v2281_v20 }
 0x262   : > { %v1336_v47 = vmul.f32 -1.442695, %v2300_v43 }
 0x263   : > { %v1335_v49 = vmul.f32 -1.442695, %v2303_v45 }
 0x264   : > { %1641 = vpow2.f32 %v1336_v47 }
 0x265   : > { %1643 = vpow2.f32 %v1335_v49  ;;  %v1448_v50 = vpop.f32.mrb[6].mxu1 }
 0x266   : > { %v1634_v32 = vpop.eup %1633  ;;  %v2308_v36 = vadd.f32 %v1448_v50, %v2281_v20  ;;  %v743_v34 = vpop.f32.mrb[7].mxu1 }
 0x267   : > { %v1636_v51 = vpop.eup %1635  ;;  %v841_v53 = vadd.f32 1.0, %v1634_v32  ;;  %v2311_v55 = vadd.f32 %v743_v34, %v2281_v20 }
 0x268   : > { %v840_v56 = vadd.f32 1.0, %v1636_v51  ;;  %v1338_v57 = vmul.f32 -1.442695, %v2308_v36 }
 0x269   : > { %1645 = vrcp.f32 %v841_v53  ;;  %v1337_v58 = vmul.f32 -1.442695, %v2311_v55  ;;  %v1451_v59 = vpop.f32.mrb[8].mxu1 }
 0x26a   : > { %v1638_v60 = vpop.eup %1637  ;;  %1647 = vrcp.f32 %v840_v56  ;;  %v2316_v42 = vadd.f32 %v1451_v59, %v2281_v20  ;;  %v753_v61 = vpop.f32.mrb[9].mxu1 }
 0x26b   : > { %v1640_v40 = vpop.eup %1639  ;;  %v843_v63 = vadd.f32 1.0, %v1638_v60  ;;  %1649 = vpow2.f32 %v1338_v57  ;;  %v2319_v1 = vadd.f32 %v753_v61, %v2281_v20 }
 0x26c   : > { %v842_v2 = vadd.f32 1.0, %v1640_v40  ;;  %1651 = vpow2.f32 %v1337_v58  ;;  %v1340_v3 = vmul.f32 -1.442695, %v2316_v42 }
 0x26d   : > { %1653 = vrcp.f32 %v843_v63  ;;  %v1339_v4 = vmul.f32 -1.442695, %v2319_v1  ;;  %v1454_v5 = vpop.f32.mrb[10].mxu1 }
 0x26e   : > { %v1642_v48 = vpop.eup %1641  ;;  %1655 = vrcp.f32 %v842_v2  ;;  %v2324_v46 = vadd.f32 %v1454_v5, %v2281_v20  ;;  %v763_v6 = vpop.f32.mrb[11].mxu1 }
 0x26f   : > { %v1644_v9 = vpop.eup %1643  ;;  %v845_v11 = vadd.f32 1.0, %v1642_v48  ;;  %1657 = vpow2.f32 %v1340_v3  ;;  %v2328_v12 = vadd.f32 %v763_v6, %v2281_v20 }
 0x270   : > { %v844_v13 = vadd.f32 1.0, %v1644_v9  ;;  %1659 = vpow2.f32 %v1339_v4  ;;  %v1342_v14 = vmul.f32 -1.442695, %v2324_v46 }
 0x271   : > { %1661 = vrcp.f32 %v845_v11  ;;  %v1341_v54 = vmul.f32 -1.442695, %v2328_v12  ;;  %v1457_v52 = vpop.f32.mrb[12].mxu1 }
 0x272   : > { %1663 = vrcp.f32 %v844_v13  ;;  %v2333_v15 = vadd.f32 %v1457_v52, %v2281_v20  ;;  %v773_v16 = vpop.f32.mrb[13].mxu1 }
 0x273   : > { %v1646_v0 = vpop.eup %1645  ;;  %1665 = vpow2.f32 %v1342_v14  ;;  %v2339_v62 = vadd.f32 %v773_v16, %v2281_v20 }
 0x274   : > { %v1648_v19 = vpop.eup %1647  ;;  %v889_v21 = vmul.f32 %v1646_v0, %v2284_v23  ;;  %1667 = vpow2.f32 %v1341_v54  ;;  %v1344_v10 = vmul.f32 -1.442695, %v2333_v15 }
 0x275   : > { %v1650_v22 = vpop.eup %1649  ;;  %v888_v8 = vmul.f32 %v1648_v19, %v2287_v25  ;;  %v1343_v18 = vmul.f32 -1.442695, %v2339_v62  ;;  %v1460_v24 = vpop.f32.mrb[14].mxu1 }
 0x276   : > { %v1652_v26 = vpop.eup %1651  ;;  %v847_v31 = vadd.f32 1.0, %v1650_v22  ;;  %1669 = vpow2.f32 %v1344_v10  ;;  %v2346_v27 = vadd.f32 %v1460_v24, %v2281_v20  ;;  %v783_v30 = vpop.f32.mrb[15].mxu1  ;;  %v909_v35 = vmul.f32 %v2336_v17, %v889_v21 }
 0x277   : > { %v1654_v38 = vpop.eup %1653  ;;  %v846_v23 = vadd.f32 1.0, %v1652_v26  ;;  %1671 = vpow2.f32 %v1343_v18  ;;  %v2350_v39 = vadd.f32 %v783_v30, %v2281_v20  ;;  %v908_v25 = vmul.f32 %v2336_v17, %v888_v8 }
 0x278   : > { %v1656_v41 = vpop.eup %1655  ;;  %v891_v44 = vmul.f32 %v1654_v38, %v2292_v33  ;;  %1673 = vrcp.f32 %v847_v31  ;;  %v1346_v47 = vmul.f32 -1.442695, %v2346_v27  ;;  %v927_v49 = vsel %vm289_vm0, %v909_v35, 0.0 }
 0x279   : > { %v1658_v50 = vpop.eup %1657  ;;  %v890_v32 = vmul.f32 %v1656_v41, %v2295_v37  ;;  %1675 = vrcp.f32 %v846_v23  ;;  %v1345_v34 = vmul.f32 -1.442695, %v2350_v39  ;;  %928 = vadd.xlane.f32.xlu0 %v927_v49  ;;  %v924_v33 = vsel %vm289_vm0, %v908_v25, 0.0  ;;  %v972_v49 = vld [vmem:[#allocation8] sm:$0xff] }
 0x27a   : > { %v1660_v51 = vpop.eup %1659  ;;  %v849_v20 = vadd.f32 1.0, %v1658_v50  ;;  %1677 = vpow2.f32 %v1346_v47  ;;  %v911_v53 = vmul.f32 %v2336_v17, %v891_v44  ;;  %v1893_v31 = vmov 0.0|0.0   ;;  %v973_v50 = vld [vmem:[#allocation8 + $0x8] sm:$0xff] }
 0x27b   : > { %v1662_v56 = vpop.eup %1661  ;;  %v848_v57 = vadd.f32 1.0, %v1660_v51  ;;  %1679 = vpow2.f32 %v1345_v34  ;;  %v910_v60 = vmul.f32 %v2336_v17, %v890_v32  ;;  %1484 = vmatprep.subr.bf16.mxu0 %v1893_v31 }
 0x27c   : > { %v1664_v58 = vpop.eup %1663  ;;  %v893_v59 = vmul.f32 %v1662_v56, %v2300_v43  ;;  %1681 = vrcp.f32 %v849_v20  ;;  %v933_v37 = vsel %vm289_vm0, %v911_v53, 0.0  ;;  %v1485_v20 = vpack.c.bf16 %v973_v50, %v972_v49 }
 0x27d   : > { %v1666_v61 = vpop.eup %1665  ;;  %v892_v40 = vmul.f32 %v1664_v58, %v2303_v45  ;;  %1683 = vrcp.f32 %v848_v57  ;;  %934 = vadd.xlane.f32.xlu1 %v933_v37  ;;  %925 = vadd.xlane.f32.xlu0 %v924_v33  ;;  %v930_v43 = vsel %vm289_vm0, %v910_v60, 0.0 }
 0x27e   : > { %v1668_v63 = vpop.eup %1667  ;;  %v851_v2 = vadd.f32 1.0, %v1666_v61  ;;  %v913_v48 = vmul.f32 %v2336_v17, %v893_v59  ;;  %1486 = vmatpush3.bf16.msra.mxu0 %v1485_v20 }
 0x27f   : > { %v850_v3 = vadd.f32 1.0, %v1668_v63  ;;  %v912_v4 = vmul.f32 %v2336_v17, %v892_v40 }
 0x280   : > { %v1670_v5 = vpop.eup %1669  ;;  %1685 = vrcp.f32 %v851_v2  ;;  %v939_v16 = vsel %vm289_vm0, %v913_v48, 0.0  ;;  %v991_v48 = vand.u32 127, %v285_v28 }
 0x281   : > { %v1672_v6 = vpop.eup %1671  ;;  %1687 = vrcp.f32 %v850_v3  ;;  %v853_v7 = vadd.f32 1.0, %v1670_v5  ;;  %931 = vadd.xlane.f32.xlu1 %v930_v43  ;;  %v936_v45 = vsel %vm289_vm0, %v912_v4, 0.0 }
 0x282   : > { %v1674_v9 = vpop.eup %1673  ;;  %v852_v11 = vadd.f32 1.0, %v1672_v6  ;;  %937 = vadd.xlane.f32.xlu0 %v936_v45 }
 0x283   : > { %v1676_v13 = vpop.eup %1675  ;;  %v895_v14 = vmul.f32 %v1674_v9, %v2308_v36  ;;  %1689 = vrcp.f32 %v853_v7 }
 0x284   : > { %v1678_v54 = vpop.eup %1677  ;;  %v894_v52 = vmul.f32 %v1676_v13, %v2311_v55  ;;  %1691 = vrcp.f32 %v852_v11  ;;  %v994_v11 = vsub.s32 %v991_v48, %v2175_v29 }
 0x285   : > { %v1680_v0 = vpop.eup %1679  ;;  %v855_v19 = vadd.f32 1.0, %v1678_v54  ;;  %940 = vadd.xlane.f32.xlu1 %v939_v16  ;;  %v915_v21 = vmul.f32 %v2336_v17, %v895_v14 }
 0x286   : > { %v1682_v10 = vpop.eup %1681  ;;  %v854_v22 = vadd.f32 1.0, %v1680_v0  ;;  %v914_v8 = vmul.f32 %v2336_v17, %v894_v52 }
 0x287   : > { %v1684_v18 = vpop.eup %1683  ;;  %v897_v24 = vmul.f32 %v1682_v10, %v2316_v42  ;;  %1693 = vrcp.f32 %v855_v19  ;;  %v945_v26 = vsel %vm289_vm0, %v915_v21, 0.0 }
 0x288   : > { %v896_v36 = vmul.f32 %v1684_v18, %v2319_v1  ;;  %1695 = vrcp.f32 %v854_v22  ;;  %v942_v55 = vsel %vm289_vm0, %v914_v8, 0.0 }
 0x289   : > { %943 = vadd.xlane.f32.xlu0 %v942_v55  ;;  %946 = vadd.xlane.f32.xlu1 %v945_v26  ;;  %v917_v30 = vmul.f32 %v2336_v17, %v897_v24 }
 0x28a   : > { %v1686_v35 = vpop.eup %1685  ;;  %v916_v38 = vmul.f32 %v2336_v17, %v896_v36 }
 0x28b   : > { %v1688_v23 = vpop.eup %1687  ;;  %v899_v42 = vmul.f32 %v1686_v35, %v2324_v46  ;;  %v951_v41 = vsel %vm289_vm0, %v917_v30, 0.0 }
 0x28c   : > { %v898_v25 = vmul.f32 %v1688_v23, %v2328_v12  ;;  %v948_v1 = vsel %vm289_vm0, %v916_v38, 0.0 }
 0x28d   : > { %v1690_v44 = vpop.eup %1689  ;;  %949 = vadd.xlane.f32.xlu0 %v948_v1  ;;  %952 = vadd.xlane.f32.xlu1 %v951_v41  ;;  %v919_v47 = vmul.f32 %v2336_v17, %v899_v42 }
 0x28e   : > { %v1692_v32 = vpop.eup %1691  ;;  %v901_v34 = vmul.f32 %v1690_v44, %v2333_v15  ;;  %v918_v51 = vmul.f32 %v2336_v17, %v898_v25 }
 0x28f   : > { %v900_v46 = vmul.f32 %v1692_v32, %v2339_v62  ;;  %v957_v53 = vsel %vm289_vm0, %v919_v47, 0.0 }
 0x290   : > { %v954_v12 = vsel %vm289_vm0, %v918_v51, 0.0  ;;  %v921_v56 = vmul.f32 %v2336_v17, %v901_v34 }
 0x291   : > { %v1694_v57 = vpop.eup %1693  ;;  %955 = vadd.xlane.f32.xlu0 %v954_v12  ;;  %958 = vadd.xlane.f32.xlu1 %v957_v53  ;;  %v920_v33 = vmul.f32 %v2336_v17, %v900_v46 }
 0x292   : > { %v1696_v58 = vpop.eup %1695  ;;  %v903_v15 = vmul.f32 %v1694_v57, %v2346_v27  ;;  %v963_v62 = vsel %vm289_vm0, %v921_v56, 0.0  ;;  %v1895_v27 = vmov 0.0  }
 0x293   : > { %v902_v59 = vmul.f32 %v1696_v58, %v2350_v39  ;;  %v960_v37 = vsel %vm289_vm0, %v920_v33, 0.0  ;;  %1465 = vmatprep.mubr.msk.f32.mxu0 %vm1894_vm1, %v1895_v27 }
 0x294   : > { %v923_v60 = vmul.f32 %v2336_v17, %v903_v15 }
 0x295   : > { %961 = vadd.xlane.f32.xlu0 %v960_v37  ;;  %964 = vadd.xlane.f32.xlu1 %v963_v62  ;;  %v922_v61 = vmul.f32 %v2336_v17, %v902_v59  ;;  %v996_v17 = vadd.s32 4294967288, %v991_v48 }
 0x296   : > { %v969_v63 = vsel %vm289_vm0, %v923_v60, 0.0 }
 0x297   : > { %v966_v40 = vsel %vm289_vm0, %v922_v61, 0.0  ;;  %v999_v13 = vsub.s32 %v996_v17, %v2175_v29 }
 0x299   : > { %967 = vadd.xlane.f32.xlu0 %v966_v40  ;;  %970 = vadd.xlane.f32.xlu1 %v969_v63 }
 0x306   : > { %v929_v39 = vpop.xlane.xlu0 %928 }
 0x307   : > { %v1000_v22 = vrot.slane %v929_v39, %v999_v13 }
 0x30a   : > { %v935_v2 = vpop.xlane.xlu1 %934  ;;  %v926_v3 = vpop.xlane.xlu0 %925 }
 0x30b   : > { %v1010_v0 = vrot.slane %v935_v2, %v999_v13  ;;  %v995_v19 = vrot.slane %v926_v3, %v994_v11 }
 0x30d   : > { %v1002_v31 = vsel %vm1001_vm2, %v1000_v22, %v995_v19 }
 0x30e   : > { %v932_v4 = vpop.xlane.xlu1 %931 }
 0x30f   : > { %v938_v5 = vpop.xlane.xlu0 %937  ;;  %v1006_v14 = vrot.slane %v932_v4, %v994_v11 }
 0x310   : > { %v1015_v10 = vrot.slane %v938_v5, %v994_v11 }
 0x311   : > { %v1011_v8 = vsel %vm1001_vm2, %v1010_v0, %v1006_v14 }
 0x312   : > { %v941_v43 = vpop.xlane.xlu1 %940  ;;  %v1067_v23 = vsel %vm1066_vm3, %v1011_v8, %v1002_v31 }
 0x313   : > { %v1019_v54 = vrot.slane %v941_v43, %v999_v13 }
 0x315   : > { %v1020_v36 = vsel %vm1001_vm2, %v1019_v54, %v1015_v10 }
 0x316   : > { %v944_v6 = vpop.xlane.xlu0 %943  ;;  %v947_v7 = vpop.xlane.xlu1 %946  ;;  %v1069_v1 = vsel %vm1068_vm4, %v1020_v36, %v1067_v23 }
 0x317   : > { %v1028_v21 = vrot.slane %v947_v7, %v999_v13  ;;  %v1024_v18 = vrot.slane %v944_v6, %v994_v11 }
 0x319   : > { %v1029_v30 = vsel %vm1001_vm2, %v1028_v21, %v1024_v18 }
 0x31a   : > { %v950_v45 = vpop.xlane.xlu0 %949  ;;  %v953_v9 = vpop.xlane.xlu1 %952  ;;  %v1071_v44 = vsel %vm1070_vm5, %v1029_v30, %v1069_v1 }
 0x31b   : > { %v1037_v28 = vrot.slane %v953_v9, %v999_v13  ;;  %v1033_v29 = vrot.slane %v950_v45, %v994_v11 }
 0x31d   : > { %v1038_v42 = vsel %vm1001_vm2, %v1037_v28, %v1033_v29 }
 0x31e   : > { %v956_v52 = vpop.xlane.xlu0 %955  ;;  %v959_v16 = vpop.xlane.xlu1 %958  ;;  %v1073_v32 = vsel %vm1072_vm6, %v1038_v42, %v1071_v44 }
 0x31f   : > { %v1046_v24 = vrot.slane %v959_v16, %v999_v13  ;;  %v1042_v35 = vrot.slane %v956_v52, %v994_v11 }
 0x321   : > { %v1047_v41 = vsel %vm1001_vm2, %v1046_v24, %v1042_v35 }
 0x322   : > { %v962_v55 = vpop.xlane.xlu0 %961  ;;  %v965_v26 = vpop.xlane.xlu1 %964  ;;  %v1075_v20 = vsel %vm1074_vm7, %v1047_v41, %v1073_v32 }
 0x323   : > { %v1055_v38 = vrot.slane %v965_v26, %v999_v13  ;;  %v1051_v25 = vrot.slane %v962_v55, %v994_v11 }
 0x325   : > { %v1056_v47 = vsel %vm1001_vm2, %v1055_v38, %v1051_v25 }
 0x326   : > { %v968_v49 = vpop.xlane.xlu0 %967  ;;  %v971_v50 = vpop.xlane.xlu1 %970  ;;  %v1077_v46 = vsel %vm1076_vm8, %v1056_v47, %v1075_v20 }
 0x327   : > { %v1060_v34 = vrot.slane %v968_v49, %v994_v11  ;;  %v1064_v51 = vrot.slane %v971_v50, %v999_v13 }
 0x329   : > { %v1065_v12 = vsel %vm1001_vm2, %v1064_v51, %v1060_v34 }
 0x32a   : > { %v1079_v53 = vsel %vm1078_vm9, %v1065_v12, %v1077_v46 }
 0x32b   : > { %1466 = vmatmul.mubr.msk.f32.vlgmr.msra.gmra.mrb[16].mxu0 %vm1080_vm10, %v1079_v53 }
 0x3fe   : > { %v1149_v56 = vpop.f32.mrb[16].mxu0 }
 0x3ff   : > { %1153 = vst [vmem:[%s258_s23] sm:$0xff] %v1149_v56  ;;  %v1467_v57 = vpop.f32.mrb[17].mxu0 }
 0x400   : > { %1824 = shalt.err (!%p1821_p4)
}
 0x401   : > { %s1825_s7 = scalar_lea.hbm %s2418_s9, 128  ;;  %s1829_s25 = scalar_lea.hbm %s2464_s4, 256 }
 0x402   : > { %p1826_p9 = scmp.ne.s32.totalorder %s2418_s9, %s1825_s7  ;;  %p1830_p8 = scmp.lt.u32.totalorder %s2418_s9, %s2464_s4 }
 0x403   : > { %p1831_p13 = scmp.lt.u32.totalorder %s1829_s25, %s1825_s7  ;;  %p1833_p10 = scmp.lt.u32.totalorder %s1825_s7, %s2418_s9 }
 0x404   : > { %p1827_p0 = pnand %p1826_p9, %p2073_p5 }
 0x405   : > { %p1832_p6 = por %p1831_p13, %p1830_p8 }
 0x406   : > { %p1828_p11 = pneg %p1827_p0 }
 0x407   : > { %p1834_p3 = por %p1833_p10, %p1832_p6 }
 0x409   : > { %p1835_p7 = pnand %p1834_p3, %p1828_p11 }
 0x40b   : > { %1838 = shalt.err (!%p1835_p7)
}
 0x40c   : > { %1501 = dma.vmem_to_hbm [thread:$0]  (%p2073_p5), %s2413_s14, 128, %s2418_s9, %s1155_s28  }
 0x40d PF: > { %s1180_s21 = sand.u32 1, %s1873_s15   ;;  %p2482_p12 = scmp.ne.s32.totalorder %s2469_s22, 0 }
 0x40e   : > { %p2483_p1 = scmp.ge.s32.totalorder %s1885_s18, 2  ;;  %s1181_s23 = scalar_lea.sflag [#allocation4], %s1180_s21 }
 0x410   : > { %p1518_p2 = pnand %p2483_p1, %p2482_p12 }
 0x412   : > { %1868 = dma.done.wait (!%p1518_p2), %s1181_s23, 128  }
 0x413   : > { %1870 = vsyncadd (!%p1518_p2), %s1181_s23, 4294967168  ;;  %p19_p4 = scmp.ge.s32.totalorder %s2059_s10, 4   ;;  %s2484_s15 = smov %s1877_s16 }
 0x414   : > { %s2485_s16 = smov %s1881_s17  ;;  %s2486_s17 = smov %s2069_s12 }
 0x415   : > { %s2487_s18 = smov %s2059_s10  ;;  %21 = sbr.rel (!%p19_p4) target bundleno = 7 (0x7), region = 93 }
 0x41c   :  { %1186 = vsyncpa [#allocation3], 1 }
 0x41d   :  { %1188 = vsyncpa [#allocation3 + $0x1], 1 }
 0x41e   :  { %1189 = vsyncpa [#allocation6], 1 }
 0x41f   :  { %1190 = vsyncpa [#allocation9], 1 }
 0x420   :  { %1191 = vsyncpa [#allocation4], 1 }
 0x421   :  { %1193 = vsyncpa [#allocation4 + $0x1], 1 }

</bundles_post_ra>
